<compile_context>
chip_gen: v5e
topology: v5e:2x2
jax: 0.10.0
libtpu: 0.0.40
codegen_flags: <defaults>
</compile_context>

<pallas_src>
import jax
import jax.numpy as jnp
from jax.experimental import pallas as pl
from jax.experimental.pallas import tpu as pltpu

LOG_STD_MAX = 2.0
LOG_STD_MIN = -20.0
BN_EPS = 1e-3  # BatchRenorm default eps


# ----------------------------------------------------------------------------
# Kernel
# ----------------------------------------------------------------------------
def actor_kernel(x_ref, w1_ref, b1_ref, w2_ref, b2_ref,
                 wm_ref, bm_ref, wl_ref, bl_ref,
                 mean_ref, logstd_ref):
    bf16 = jnp.bfloat16

    # Layer 1 (bn1 folded into fc1) + ReLU  -- bf16 operands, f32 accumulate.
    h = jnp.dot(x_ref[...].astype(bf16), w1_ref[...],
                preferred_element_type=jnp.float32)
    h = jnp.maximum(h + b1_ref[...], 0.0)

    # Layer 2 (bn2 folded into fc2) + ReLU
    h = jnp.dot(h.astype(bf16), w2_ref[...],
                preferred_element_type=jnp.float32)
    h = jnp.maximum(h + b2_ref[...], 0.0)

    # Heads (bn3 folded in). Two small matmuls; outputs written directly
    # (no padded slab, no wrapper slicing).
    hb = h.astype(bf16)
    mean = jnp.dot(hb, wm_ref[...], preferred_element_type=jnp.float32) + bm_ref[...]
    z = jnp.dot(hb, wl_ref[...], preferred_element_type=jnp.float32) + bl_ref[...]

    log_std = jnp.tanh(z)
    log_std = LOG_STD_MIN + 0.5 * (LOG_STD_MAX - LOG_STD_MIN) * (log_std + 1.0)

    mean_ref[...] = mean
    logstd_ref[...] = log_std


# ----------------------------------------------------------------------------
# Host-side parameter folding (eval-mode BatchRenorm -> Linear)
# ----------------------------------------------------------------------------
def fold_params(p):
    """Fold the eval-mode BatchRenorm layers into the linear weights.

    Weights are returned in bfloat16 (halves weight DMA, native MXU rate);
    biases stay in float32 (keeps the BN-folded offsets at full precision)."""

    def bn_affine(mean, var, scale, bias):
        g = scale / jnp.sqrt(var + BN_EPS)   # (1, N)
        c = bias - mean * g                  # (1, N)
        return g, c

    # bn1 -> fc1
    g1, c1 = bn_affine(p["bn1_mean"], p["bn1_var"], p["bn1_scale"], p["bn1_bias"])
    w1 = p["w1"] * g1.reshape(-1, 1)
    b1 = p["b1"] + c1 @ p["w1"]

    # bn2 -> fc2
    g2, c2 = bn_affine(p["bn2_mean"], p["bn2_var"], p["bn2_scale"], p["bn2_bias"])
    w2 = p["w2"] * g2.reshape(-1, 1)
    b2 = p["b2"] + c2 @ p["w2"]

    # bn3 -> both heads
    g3, c3 = bn_affine(p["bn3_mean"], p["bn3_var"], p["bn3_scale"], p["bn3_bias"])
    wm = p["wm"] * g3.reshape(-1, 1)
    bm = p["bm"] + c3 @ p["wm"]
    wl = p["wl"] * g3.reshape(-1, 1)
    bl = p["bl"] + c3 @ p["wl"]

    bf16 = jnp.bfloat16
    return {
        "w1": w1.astype(bf16), "b1": b1.astype(jnp.float32),
        "w2": w2.astype(bf16), "b2": b2.astype(jnp.float32),
        "wm": wm.astype(bf16), "bm": bm.astype(jnp.float32),
        "wl": wl.astype(bf16), "bl": bl.astype(jnp.float32),
    }


# ----------------------------------------------------------------------------
# Wrapper
# ----------------------------------------------------------------------------
def _round_up(x, m):
    return ((x + m - 1) // m) * m


def _choose_tile(batch, tile_b):
    # Small batches: single tile (rounded to a sublane multiple).
    if batch <= 256:
        return _round_up(batch, 8)
    # Large batches: multiple-of-256 tile (keeps 256x256 MXU full on v6e/v7x,
    # is also a multiple of 128 for v5e) and guarantees >=2 tiles so the
    # "parallel" grid axis can shard across v7x's two TensorCores.
    return min(tile_b, _round_up(pl.cdiv(batch, 2), 256))


def actor_forward(x, folded, *, tile_b=512):
    """x: [B, obs_dim] float32. folded: output of fold_params.
    Returns (mean, log_std), each [B, act_dim] float32."""
    B, obs_dim = x.shape
    hidden = folded["w1"].shape[1]
    act_dim = folded["wm"].shape[1]

    tb = _choose_tile(B, tile_b)
    B_pad = _round_up(B, tb)
    grid = (B_pad // tb,)
    if B_pad != B:
        x = jnp.pad(x, ((0, B_pad - B), (0, 0)))

    def const_spec(shape):
        zeros = (0,) * len(shape)
        return pl.BlockSpec(shape, lambda i, _z=zeros: _z)

    args = (x, folded["w1"], folded["b1"], folded["w2"], folded["b2"],
            folded["wm"], folded["bm"], folded["wl"], folded["bl"])

    flops = 2 * B_pad * (obs_dim * hidden + hidden * hidden + 2 * hidden * act_dim)
    bytes_accessed = (sum(int(a.size) * a.dtype.itemsize for a in args)
                      + 2 * B_pad * act_dim * 4)
    cost = pl.CostEstimate(flops=flops,
                           transcendentals=B_pad * act_dim,
                           bytes_accessed=bytes_accessed)

    mean, log_std = pl.pallas_call(
        actor_kernel,
        grid=grid,
        in_specs=[
            pl.BlockSpec((tb, obs_dim), lambda i: (i, 0)),
            const_spec((obs_dim, hidden)), const_spec((1, hidden)),
            const_spec((hidden, hidden)), const_spec((1, hidden)),
            const_spec((hidden, act_dim)), const_spec((1, act_dim)),
            const_spec((hidden, act_dim)), const_spec((1, act_dim)),
        ],
        out_specs=[
            pl.BlockSpec((tb, act_dim), lambda i: (i, 0)),
            pl.BlockSpec((tb, act_dim), lambda i: (i, 0)),
        ],
        out_shape=[
            jax.ShapeDtypeStruct((B_pad, act_dim), jnp.float32),
            jax.ShapeDtypeStruct((B_pad, act_dim), jnp.float32),
        ],
        compiler_params=pltpu.CompilerParams(
            dimension_semantics=("parallel",),
        ),
        cost_estimate=cost,
    )(*args)

    return mean[:B], log_std[:B]


# ----------------------------------------------------------------------------
# Synthetic parameters + references
# ----------------------------------------------------------------------------
def make_params(key, obs_dim, hidden, act_dim):
    """Deterministic synthetic parameters (shapes follow Actor.__init__)."""
    ks = jax.random.split(key, 16)

    def lin(kw, kb, fan_in, fan_out):
        bound = 1.0 / jnp.sqrt(float(fan_in))
        w = jax.random.uniform(kw, (fan_in, fan_out), jnp.float32, -bound, bound)
        b = jax.random.uniform(kb, (1, fan_out), jnp.float32, -bound, bound)
        return w, b

    def bn(km, kv, n):
        mean = 0.1 * jax.random.normal(km, (1, n), jnp.float32)
        var = 1.0 + 0.1 * jax.random.uniform(kv, (1, n), jnp.float32)
        scale = jnp.ones((1, n), jnp.float32)
        bias = jnp.zeros((1, n), jnp.float32)
        return mean, var, scale, bias

    w1, b1 = lin(ks[0], ks[1], obs_dim, hidden)
    w2, b2 = lin(ks[2], ks[3], hidden, hidden)
    wm, bm = lin(ks[4], ks[5], hidden, act_dim)
    wl, bl = lin(ks[6], ks[7], hidden, act_dim)
    bn1 = bn(ks[8], ks[9], obs_dim)
    bn2 = bn(ks[10], ks[11], hidden)
    bn3 = bn(ks[12], ks[13], hidden)

    return {
        "bn1_mean": bn1[0], "bn1_var": bn1[1], "bn1_scale": bn1[2], "bn1_bias": bn1[3],
        "w1": w1, "b1": b1,
        "bn2_mean": bn2[0], "bn2_var": bn2[1], "bn2_scale": bn2[2], "bn2_bias": bn2[3],
        "w2": w2, "b2": b2,
        "bn3_mean": bn3[0], "bn3_var": bn3[1], "bn3_scale": bn3[2], "bn3_bias": bn3[3],
        "wm": wm, "bm": bm,
        "wl": wl, "bl": bl,
    }


def actor_forward_ref_f32(x, p):
    """Pure-JAX f32 reference matching the PyTorch forward in eval mode."""
    def bn(h, m, v, s, b):
        return (h - m) / jnp.sqrt(v + BN_EPS) * s + b

    h = bn(x, p["bn1_mean"], p["bn1_var"], p["bn1_scale"], p["bn1_bias"])
    h = jnp.maximum(h @ p["w1"] + p["b1"], 0.0)
    h = bn(h, p["bn2_mean"], p["bn2_var"], p["bn2_scale"], p["bn2_bias"])
    h = jnp.maximum(h @ p["w2"] + p["b2"], 0.0)
    h = bn(h, p["bn3_mean"], p["bn3_var"], p["bn3_scale"], p["bn3_bias"])
    mean = h @ p["wm"] + p["bm"]
    log_std = jnp.tanh(h @ p["wl"] + p["bl"])
    log_std = LOG_STD_MIN + 0.5 * (LOG_STD_MAX - LOG_STD_MIN) * (log_std + 1.0)
    return mean, log_std


def actor_forward_ref_folded(x, folded):
    """Pure-JAX reference using the same folded bf16 weights / f32 accumulate
    math as the kernel (isolates kernel correctness from bf16 rounding)."""
    bf16 = jnp.bfloat16
    h = jnp.dot(x.astype(bf16), folded["w1"], preferred_element_type=jnp.float32)
    h = jnp.maximum(h + folded["b1"], 0.0)
    h = jnp.dot(h.astype(bf16), folded["w2"], preferred_element_type=jnp.float32)
    h = jnp.maximum(h + folded["b2"], 0.0)
    hb = h.astype(bf16)
    mean = jnp.dot(hb, folded["wm"], preferred_element_type=jnp.float32) + folded["bm"]
    z = jnp.dot(hb, folded["wl"], preferred_element_type=jnp.float32) + folded["bl"]
    log_std = jnp.tanh(z)
    log_std = LOG_STD_MIN + 0.5 * (LOG_STD_MAX - LOG_STD_MIN) * (log_std + 1.0)
    return mean, log_std


if __name__ == "__main__":
    # Small shapes implied by the module: obs_dim -> 256 -> 256 -> act_dim
    B, OBS_DIM, HIDDEN, ACT_DIM = 8, 16, 256, 8

    key = jax.random.PRNGKey(0)
    k_x, k_p, k_x2 = jax.random.split(key, 3)
    x = jax.random.normal(k_x, (B, OBS_DIM), jnp.float32)
    params = make_params(k_p, OBS_DIM, HIDDEN, ACT_DIM)

    folded = fold_params(params)  # host-side, done once per parameter update

    # --- small-batch run (deployment-like, single grid point) ---
    mean, log_std = actor_forward(x, folded)
    mean, log_std = jax.block_until_ready((mean, log_std))

    # Exact-math check against a reference using identical bf16-weight math.
    mean_fr, log_std_fr = actor_forward_ref_folded(x, folded)
    assert jnp.allclose(mean, mean_fr, atol=2e-3, rtol=2e-3), "mean mismatch (folded ref)"
    assert jnp.allclose(log_std, log_std_fr, atol=2e-3, rtol=2e-3), "log_std mismatch (folded ref)"

    # Sanity check against the full-precision PyTorch-semantics reference
    # (looser tolerance: bf16 matmul operands, per the perf review).
    mean_ref, log_std_ref = actor_forward_ref_f32(x, params)
    assert jnp.allclose(mean, mean_ref, atol=5e-2, rtol=5e-2), "mean mismatch (f32 ref)"
    assert jnp.allclose(log_std, log_std_ref, atol=2e-1, rtol=5e-2), "log_std mismatch (f32 ref)"
    assert jnp.all(log_std >= LOG_STD_MIN) and jnp.all(log_std <= LOG_STD_MAX)

    # --- larger, non-divisible batch: exercises cdiv tiling + padding +
    #     multi-tile "parallel" grid (v7x megacore path) ---
    B2 = 300
    x2 = jax.random.normal(k_x2, (B2, OBS_DIM), jnp.float32)
    mean2, log_std2 = actor_forward(x2, folded)
    mean2, log_std2 = jax.block_until_ready((mean2, log_std2))
    mean2_fr, log_std2_fr = actor_forward_ref_folded(x2, folded)
    assert mean2.shape == (B2, ACT_DIM) and log_std2.shape == (B2, ACT_DIM)
    assert jnp.allclose(mean2, mean2_fr, atol=2e-3, rtol=2e-3), "mean mismatch (B=300)"
    assert jnp.allclose(log_std2, log_std2_fr, atol=2e-3, rtol=2e-3), "log_std mismatch (B=300)"

    print("KERNEL_OK")
</pallas_src>

<mosaic_0001>
module attributes {stable_mosaic.version = 11 : i64} {
  func.func @actor_kernel(%arg0: i32, %arg1: memref<8x16xf32, #tpu.memory_space<vmem>>, %arg2: memref<16x256xbf16, #tpu.memory_space<vmem>>, %arg3: memref<1x256xf32, #tpu.memory_space<vmem>>, %arg4: memref<256x256xbf16, #tpu.memory_space<vmem>>, %arg5: memref<1x256xf32, #tpu.memory_space<vmem>>, %arg6: memref<256x8xbf16, #tpu.memory_space<vmem>>, %arg7: memref<1x8xf32, #tpu.memory_space<vmem>>, %arg8: memref<256x8xbf16, #tpu.memory_space<vmem>>, %arg9: memref<1x8xf32, #tpu.memory_space<vmem>>, %arg10: memref<8x8xf32, #tpu.memory_space<vmem>>, %arg11: memref<8x8xf32, #tpu.memory_space<vmem>>) attributes {dimension_semantics = [#tpu.dimension_semantics<parallel>], iteration_bounds = array<i64: 1>, scalar_prefetch = 0 : i64, scratch_operands = 0 : i64, tpu.core_type = #tpu.core_type<tc>, window_params = [{transform_indices = @transform_0, window_bounds = array<i64: 8, 16>}, {pipeline_mode = #tpu.pipeline_mode<synchronous>, transform_indices = @transform_1, window_bounds = array<i64: 16, 256>}, {pipeline_mode = #tpu.pipeline_mode<synchronous>, transform_indices = @transform_2, window_bounds = array<i64: 1, 256>}, {pipeline_mode = #tpu.pipeline_mode<synchronous>, transform_indices = @transform_3, window_bounds = array<i64: 256, 256>}, {pipeline_mode = #tpu.pipeline_mode<synchronous>, transform_indices = @transform_4, window_bounds = array<i64: 1, 256>}, {pipeline_mode = #tpu.pipeline_mode<synchronous>, transform_indices = @transform_5, window_bounds = array<i64: 256, 8>}, {pipeline_mode = #tpu.pipeline_mode<synchronous>, transform_indices = @transform_6, window_bounds = array<i64: 1, 8>}, {pipeline_mode = #tpu.pipeline_mode<synchronous>, transform_indices = @transform_7, window_bounds = array<i64: 256, 8>}, {pipeline_mode = #tpu.pipeline_mode<synchronous>, transform_indices = @transform_8, window_bounds = array<i64: 1, 8>}, {transform_indices = @transform_9, window_bounds = array<i64: 8, 8>}, {transform_indices = @transform_10, window_bounds = array<i64: 8, 8>}]} {
    %c0 = arith.constant 0 : index
    %c0_0 = arith.constant 0 : index
    %0 = vector.load %arg1[%c0, %c0_0] : memref<8x16xf32, #tpu.memory_space<vmem>>, vector<8x16xf32>
    %1 = arith.truncf %0 : vector<8x16xf32> to vector<8x16xbf16>
    %c0_1 = arith.constant 0 : index
    %c0_2 = arith.constant 0 : index
    %2 = vector.load %arg2[%c0_1, %c0_2] : memref<16x256xbf16, #tpu.memory_space<vmem>>, vector<16x256xbf16>
    %cst = arith.constant dense<0.000000e+00> : vector<8x256xf32>
    %3 = tpu.matmul %1, %2, %cst {dimension_numbers = #tpu.dot_dimension_numbers<[1], [0], [0], [1], [0, 0, 1, 1], [], []>} : vector<8x16xbf16>, vector<16x256xbf16>, vector<8x256xf32> -> vector<8x256xf32>
    %c0_3 = arith.constant 0 : index
    %c0_4 = arith.constant 0 : index
    %4 = vector.load %arg3[%c0_3, %c0_4] : memref<1x256xf32, #tpu.memory_space<vmem>>, vector<1x256xf32>
    %5 = vector.broadcast %4 : vector<1x256xf32> to vector<8x256xf32>
    %6 = arith.addf %3, %5 : vector<8x256xf32>
    %cst_5 = arith.constant 0.000000e+00 : f32
    %7 = vector.broadcast %cst_5 : f32 to vector<8x256xf32>
    %8 = arith.maximumf %6, %7 : vector<8x256xf32>
    %9 = arith.truncf %8 : vector<8x256xf32> to vector<8x256xbf16>
    %c0_6 = arith.constant 0 : index
    %c0_7 = arith.constant 0 : index
    %10 = vector.load %arg4[%c0_6, %c0_7] : memref<256x256xbf16, #tpu.memory_space<vmem>>, vector<256x256xbf16>
    %cst_8 = arith.constant dense<0.000000e+00> : vector<8x256xf32>
    %11 = tpu.matmul %9, %10, %cst_8 {dimension_numbers = #tpu.dot_dimension_numbers<[1], [0], [0], [1], [0, 0, 1, 1], [], []>} : vector<8x256xbf16>, vector<256x256xbf16>, vector<8x256xf32> -> vector<8x256xf32>
    %c0_9 = arith.constant 0 : index
    %c0_10 = arith.constant 0 : index
    %12 = vector.load %arg5[%c0_9, %c0_10] : memref<1x256xf32, #tpu.memory_space<vmem>>, vector<1x256xf32>
    %13 = vector.broadcast %12 : vector<1x256xf32> to vector<8x256xf32>
    %14 = arith.addf %11, %13 : vector<8x256xf32>
    %cst_11 = arith.constant 0.000000e+00 : f32
    %15 = vector.broadcast %cst_11 : f32 to vector<8x256xf32>
    %16 = arith.maximumf %14, %15 : vector<8x256xf32>
    %17 = arith.truncf %16 : vector<8x256xf32> to vector<8x256xbf16>
    %c0_12 = arith.constant 0 : index
    %c0_13 = arith.constant 0 : index
    %18 = vector.load %arg6[%c0_12, %c0_13] : memref<256x8xbf16, #tpu.memory_space<vmem>>, vector<256x8xbf16>
    %cst_14 = arith.constant dense<0.000000e+00> : vector<8x8xf32>
    %19 = tpu.matmul %17, %18, %cst_14 {dimension_numbers = #tpu.dot_dimension_numbers<[1], [0], [0], [1], [0, 0, 1, 1], [], []>} : vector<8x256xbf16>, vector<256x8xbf16>, vector<8x8xf32> -> vector<8x8xf32>
    %c0_15 = arith.constant 0 : index
    %c0_16 = arith.constant 0 : index
    %20 = vector.load %arg7[%c0_15, %c0_16] : memref<1x8xf32, #tpu.memory_space<vmem>>, vector<1x8xf32>
    %21 = vector.broadcast %20 : vector<1x8xf32> to vector<8x8xf32>
    %22 = arith.addf %19, %21 : vector<8x8xf32>
    %c0_17 = arith.constant 0 : index
    %c0_18 = arith.constant 0 : index
    %23 = vector.load %arg8[%c0_17, %c0_18] : memref<256x8xbf16, #tpu.memory_space<vmem>>, vector<256x8xbf16>
    %cst_19 = arith.constant dense<0.000000e+00> : vector<8x8xf32>
    %24 = tpu.matmul %17, %23, %cst_19 {dimension_numbers = #tpu.dot_dimension_numbers<[1], [0], [0], [1], [0, 0, 1, 1], [], []>} : vector<8x256xbf16>, vector<256x8xbf16>, vector<8x8xf32> -> vector<8x8xf32>
    %c0_20 = arith.constant 0 : index
    %c0_21 = arith.constant 0 : index
    %25 = vector.load %arg9[%c0_20, %c0_21] : memref<1x8xf32, #tpu.memory_space<vmem>>, vector<1x8xf32>
    %26 = vector.broadcast %25 : vector<1x8xf32> to vector<8x8xf32>
    %27 = arith.addf %24, %26 : vector<8x8xf32>
    %28 = math.tanh %27 : vector<8x8xf32>
    %cst_22 = arith.constant 1.000000e+00 : f32
    %29 = vector.broadcast %cst_22 : f32 to vector<8x8xf32>
    %30 = arith.addf %28, %29 : vector<8x8xf32>
    %cst_23 = arith.constant 1.100000e+01 : f32
    %31 = vector.broadcast %cst_23 : f32 to vector<8x8xf32>
    %32 = arith.mulf %31, %30 : vector<8x8xf32>
    %cst_24 = arith.constant -2.000000e+01 : f32
    %33 = vector.broadcast %cst_24 : f32 to vector<8x8xf32>
    %34 = arith.addf %33, %32 : vector<8x8xf32>
    %c0_25 = arith.constant 0 : index
    %c0_26 = arith.constant 0 : index
    %35 = vector.load %arg10[%c0_25, %c0_26] : memref<8x8xf32, #tpu.memory_space<vmem>>, vector<8x8xf32>
    tpu.vector_store %arg10[%c0_25, %c0_26], %22 {strides = array<i32>} : memref<8x8xf32, #tpu.memory_space<vmem>>, vector<8x8xf32>,
    %c0_27 = arith.constant 0 : index
    %c0_28 = arith.constant 0 : index
    %36 = vector.load %arg11[%c0_27, %c0_28] : memref<8x8xf32, #tpu.memory_space<vmem>>, vector<8x8xf32>
    tpu.vector_store %arg11[%c0_27, %c0_28], %34 {strides = array<i32>} : memref<8x8xf32, #tpu.memory_space<vmem>>, vector<8x8xf32>,
    return
  }
  func.func @transform_0(%arg0: i32) -> (i32, i32) {
    %c0_i32 = arith.constant 0 : i32
    %c0_i32_0 = arith.constant 0 : i32
    return %arg0, %c0_i32 : i32, i32
  }
  func.func @transform_1(%arg0: i32) -> (i32, i32) {
    %c0_i32 = arith.constant 0 : i32
    %c0_i32_0 = arith.constant 0 : i32
    %c0_i32_1 = arith.constant 0 : i32
    return %c0_i32, %c0_i32_0 : i32, i32
  }
  func.func @transform_2(%arg0: i32) -> (i32, i32) {
    %c0_i32 = arith.constant 0 : i32
    %c0_i32_0 = arith.constant 0 : i32
    %c0_i32_1 = arith.constant 0 : i32
    return %c0_i32, %c0_i32_0 : i32, i32
  }
  func.func @transform_3(%arg0: i32) -> (i32, i32) {
    %c0_i32 = arith.constant 0 : i32
    %c0_i32_0 = arith.constant 0 : i32
    %c0_i32_1 = arith.constant 0 : i32
    return %c0_i32, %c0_i32_0 : i32, i32
  }
  func.func @transform_4(%arg0: i32) -> (i32, i32) {
    %c0_i32 = arith.constant 0 : i32
    %c0_i32_0 = arith.constant 0 : i32
    %c0_i32_1 = arith.constant 0 : i32
    return %c0_i32, %c0_i32_0 : i32, i32
  }
  func.func @transform_5(%arg0: i32) -> (i32, i32) {
    %c0_i32 = arith.constant 0 : i32
    %c0_i32_0 = arith.constant 0 : i32
    %c0_i32_1 = arith.constant 0 : i32
    return %c0_i32, %c0_i32_0 : i32, i32
  }
  func.func @transform_6(%arg0: i32) -> (i32, i32) {
    %c0_i32 = arith.constant 0 : i32
    %c0_i32_0 = arith.constant 0 : i32
    %c0_i32_1 = arith.constant 0 : i32
    return %c0_i32, %c0_i32_0 : i32, i32
  }
  func.func @transform_7(%arg0: i32) -> (i32, i32) {
    %c0_i32 = arith.constant 0 : i32
    %c0_i32_0 = arith.constant 0 : i32
    %c0_i32_1 = arith.constant 0 : i32
    return %c0_i32, %c0_i32_0 : i32, i32
  }
  func.func @transform_8(%arg0: i32) -> (i32, i32) {
    %c0_i32 = arith.constant 0 : i32
    %c0_i32_0 = arith.constant 0 : i32
    %c0_i32_1 = arith.constant 0 : i32
    return %c0_i32, %c0_i32_0 : i32, i32
  }
  func.func @transform_9(%arg0: i32) -> (i32, i32) {
    %c0_i32 = arith.constant 0 : i32
    %c0_i32_0 = arith.constant 0 : i32
    return %arg0, %c0_i32 : i32, i32
  }
  func.func @transform_10(%arg0: i32) -> (i32, i32) {
    %c0_i32 = arith.constant 0 : i32
    %c0_i32_0 = arith.constant 0 : i32
    return %arg0, %c0_i32 : i32, i32
  }
}

</mosaic_0001>

<bundles_post_ra>
// kernel: tpu_custom_call.1
= control target key start
LH: loop header
LB: loop body
LE: loop exit
PB: predicated region body
PF: predicated region fallthrough
CT: control target
= control target key end

     0   :  { %16 = vsyncpa [#allocation3], 0  ;;  %s1558_s0 = inlined_call_operand.hbm [shape: f32[8,16], index: 0, kind: input, shape index: {}]   ;;  %s1559_s1 = inlined_call_operand.vmem [shape: bf16[16,256], index: 1, kind: input, shape index: {}]   ;;  %s1560_s2 = inlined_call_operand.vmem [shape: f32[1,256], index: 2, kind: input, shape index: {}]   ;;  %s1561_s3 = inlined_call_operand.vmem [shape: bf16[256,256], index: 3, kind: input, shape index: {}]   ;;  %s1562_s4 = inlined_call_operand.hbm [shape: f32[1,256], index: 4, kind: input, shape index: {}]   ;;  %s1563_s5 = inlined_call_operand.vmem [shape: bf16[256,8], index: 5, kind: input, shape index: {}]   ;;  %s1564_s6 = inlined_call_operand.vmem [shape: f32[1,8], index: 6, kind: input, shape index: {}]   ;;  %s1565_s7 = inlined_call_operand.vmem [shape: bf16[256,8], index: 7, kind: input, shape index: {}]   ;;  %s1566_s8 = inlined_call_operand.vmem [shape: f32[1,8], index: 8, kind: input, shape index: {}]   ;;  %s1567_s9 = inlined_call_operand.hbm [shape: f32[8,8], index: 9, kind: output, shape index: {0}]   ;;  %s1568_s10 = inlined_call_operand.hbm [shape: f32[8,8], index: 10, kind: output, shape index: {1}]  }
   0x1   :  { %17 = vsyncpa [#allocation6], 0 }
   0x2   :  { %18 = vsyncpa [#allocation4], 0 }
   0x3   :  { %19 = vsyncpa [#allocation9], 0  ;;  %s25_s15 = sshll.u32 %s1558_s0, 4  ;;  %s1174_s16 = smov [#allocation2]   ;;  %s26_s15 = int_to_ptr.hbm [resolvable:$true] %s25_s15 }
   0x4   :  { %s27_s17 = sshll.u32 %s1174_s16, 4  ;;  %s42_s20 = sshll.u32 %s1562_s4, 4  ;;  %s28_s17 = int_to_ptr.vmem [resolvable:$true] %s27_s17  ;;  %s43_s20 = int_to_ptr.hbm [resolvable:$true] %s42_s20 }
   0x5   :  { %30 = dma.hbm_to_vmem [thread:$0]  %s26_s15, 128, %s28_s17, [#allocation3]  }
   0x6   :  { %s1175_s21 = smov [#allocation5]  }
   0x7   :  { %s44_s22 = sshll.u32 %s1175_s21, 4  ;;  %s45_s22 = int_to_ptr.vmem [resolvable:$true] %s44_s22 }
   0x8   :  { %47 = dma.hbm_to_vmem [thread:$0]  %s43_s20, 32, %s45_s22, [#allocation6]  }
   0x9   :  { %1166 = dma.done.wait [#allocation3], 128  }
   0xa   :  { %1167 = vsyncadd [#allocation3], 4294967168 }
   0xb   :  { %1168 = dma.done.wait [#allocation6], 32  }
   0xc   :  { %1169 = vsyncadd [#allocation6], 4294967264  ;;  %v732_v0 = vld [vmem:[%s1559_s1] sm:$0xf]  ;;  %v997_v1 = vld [vmem:[%s1559_s1 + $0x4] sm:$0xf0] }
   0xd   :  { %v996_v2 = vld [vmem:[%s1559_s1 + $0x4] sm:$0xf]  ;;  %v733_v3 = vor.u32 %v997_v1, %v732_v0  ;;  %v734_v4 = vld [vmem:[%s1559_s1 + $0x8] sm:$0xf0]  ;;  %vm85_vm0 = vcmask 130048   ;;  %s1176_s16 = smov [#allocation7]  }
   0xe   :  { %v65_v5 = vld [vmem:[#allocation2] sm:$0xff]  ;;  %v798_v6 = vld [vmem:[%s1561_s3 + $0x70] sm:$0xf]  ;;  %v737_v7 = vor.u32 %v996_v2, %v734_v4  ;;  %v1013_v9 = vld [vmem:[%s1561_s3 + $0x74] sm:$0xf0]  ;;  %s701_s1 = sshll.u32 %s1176_s16, 4  ;;  %s702_s1 = int_to_ptr.vmem [resolvable:$true] %s701_s1 }
   0xf   :  { %v66_v8 = vpack.c.bf16 %v65_v5, %v65_v5  ;;  %v862_v10 = vld [vmem:[%s1561_s3 + $0xf0] sm:$0xf]  ;;  %v1029_v11 = vld [vmem:[%s1561_s3 + $0xf4] sm:$0xf0]  ;;  %96 = vmatpush.bf16.msra.mxu0 %v733_v3  ;;  %v799_v12 = vor.u32 %v1013_v9, %v798_v6  ;;  %v1012_v14 = vld [vmem:[%s1561_s3 + $0x74] sm:$0xf] }
  0x10   :  { %v863_v13 = vor.u32 %v1029_v11, %v862_v10  ;;  %v800_v15 = vld [vmem:[%s1561_s3 + $0x78] sm:$0xf0]  ;;  %v1028_v16 = vld [vmem:[%s1561_s3 + $0xf4] sm:$0xf]  ;;  %109 = vmatpush.bf16.msra.mxu1 %v737_v7  ;;  %v790_v19 = vld [vmem:[%s1561_s3 + $0x60] sm:$0xf] }
  0x11   :  { %v803_v17 = vor.u32 %v1012_v14, %v800_v15  ;;  %v864_v18 = vld [vmem:[%s1561_s3 + $0xf8] sm:$0xf0]  ;;  %v1011_v20 = vld [vmem:[%s1561_s3 + $0x64] sm:$0xf0]  ;;  %317 = vmatpush.bf16.msra.mxu2 %v799_v12  ;;  %v854_v23 = vld [vmem:[%s1561_s3 + $0xe0] sm:$0xf] }
  0x12   :  { %330 = vmatpush.bf16.msra.mxu3 %v863_v13  ;;  %v867_v21 = vor.u32 %v1028_v16, %v864_v18  ;;  %v791_v22 = vor.u32 %v1011_v20, %v790_v19  ;;  %v1027_v24 = vld [vmem:[%s1561_s3 + $0xe4] sm:$0xf0]  ;;  %v1010_v25 = vld [vmem:[%s1561_s3 + $0x64] sm:$0xf]  ;;  %738 = vmatmul.msk.bf16.vlgmr.msra.gmra.mxu0 %vm85_vm0, %v66_v8  ;;  %v792_v27 = vld [vmem:[%s1561_s3 + $0x68] sm:$0xf0] }
  0x13   :  { %v855_v26 = vor.u32 %v1027_v24, %v854_v23  ;;  %v1026_v28 = vld [vmem:[%s1561_s3 + $0xe4] sm:$0xf]  ;;  %v856_v29 = vld [vmem:[%s1561_s3 + $0xe8] sm:$0xf0]  ;;  %739 = vmatmul.msk.bf16.vlgmr.msra.gmra.mxu1 %vm85_vm0, %v66_v8  ;;  %343 = vmatpush.bf16.msrb.mxu0 %v803_v17  ;;  %v795_v30 = vor.u32 %v1010_v25, %v792_v27  ;;  %v782_v31 = vld [vmem:[%s1561_s3 + $0x50] sm:$0xf] }
  0x14   :  { %v1009_v32 = vld [vmem:[%s1561_s3 + $0x54] sm:$0xf0]  ;;  %v846_v33 = vld [vmem:[%s1561_s3 + $0xd0] sm:$0xf]  ;;  %356 = vmatpush.bf16.msrb.mxu1 %v867_v21  ;;  %v859_v34 = vor.u32 %v1026_v28, %v856_v29  ;;  %v1008_v36 = vld [vmem:[%s1561_s3 + $0x54] sm:$0xf] }
  0x15   :  { %v1025_v35 = vld [vmem:[%s1561_s3 + $0xd4] sm:$0xf0]  ;;  %v784_v37 = vld [vmem:[%s1561_s3 + $0x58] sm:$0xf0]  ;;  %318 = vmatpush.bf16.msra.mxu2 %v791_v22  ;;  %v783_v38 = vor.u32 %v1009_v32, %v782_v31  ;;  %v1024_v40 = vld [vmem:[%s1561_s3 + $0xd4] sm:$0xf] }
  0x16   :  { %331 = vmatpush.bf16.msra.mxu3 %v855_v26  ;;  %v847_v39 = vor.u32 %v1025_v35, %v846_v33  ;;  %v848_v41 = vld [vmem:[%s1561_s3 + $0xd8] sm:$0xf0]  ;;  %v774_v42 = vld [vmem:[%s1561_s3 + $0x40] sm:$0xf]  ;;  %v1007_v43 = vld [vmem:[%s1561_s3 + $0x44] sm:$0xf0]  ;;  %v787_v46 = vor.u32 %v1008_v36, %v784_v37 }
  0x17   :  { %v838_v44 = vld [vmem:[%s1561_s3 + $0xc0] sm:$0xf]  ;;  %v1023_v45 = vld [vmem:[%s1561_s3 + $0xc4] sm:$0xf0]  ;;  %344 = vmatpush.bf16.msrb.mxu0 %v795_v30  ;;  %v851_v47 = vor.u32 %v1024_v40, %v848_v41  ;;  %v1006_v48 = vld [vmem:[%s1561_s3 + $0x44] sm:$0xf]  ;;  %v775_v50 = vor.u32 %v1007_v43, %v774_v42 }
  0x18   :  { %357 = vmatpush.bf16.msrb.mxu1 %v859_v34  ;;  %v776_v49 = vld [vmem:[%s1561_s3 + $0x48] sm:$0xf0]  ;;  %v839_v51 = vor.u32 %v1023_v45, %v838_v44  ;;  %v1022_v52 = vld [vmem:[%s1561_s3 + $0xc4] sm:$0xf]  ;;  %v766_v54 = vld [vmem:[%s1561_s3 + $0x30] sm:$0xf] }
  0x19   :  { %319 = vmatpush.bf16.msra.mxu2 %v783_v38  ;;  %v840_v53 = vld [vmem:[%s1561_s3 + $0xc8] sm:$0xf0]  ;;  %v1005_v55 = vld [vmem:[%s1561_s3 + $0x34] sm:$0xf0]  ;;  %v830_v56 = vld [vmem:[%s1561_s3 + $0xb0] sm:$0xf]  ;;  %v779_v58 = vor.u32 %v1006_v48, %v776_v49 }
  0x1a   :  { %332 = vmatpush.bf16.msra.mxu3 %v847_v39  ;;  %v1021_v57 = vld [vmem:[%s1561_s3 + $0xb4] sm:$0xf0]  ;;  %v1004_v59 = vld [vmem:[%s1561_s3 + $0x34] sm:$0xf]  ;;  %v843_v60 = vor.u32 %v1022_v52, %v840_v53  ;;  %v768_v61 = vld [vmem:[%s1561_s3 + $0x38] sm:$0xf0]  ;;  %v767_v0 = vor.u32 %v1005_v55, %v766_v54 }
  0x1b   :  { %345 = vmatpush.bf16.msrb.mxu0 %v787_v46  ;;  %v1020_v62 = vld [vmem:[%s1561_s3 + $0xb4] sm:$0xf]  ;;  %v832_v63 = vld [vmem:[%s1561_s3 + $0xb8] sm:$0xf0]  ;;  %v831_v1 = vor.u32 %v1021_v57, %v830_v56  ;;  %v758_v2 = vld [vmem:[%s1561_s3 + $0x20] sm:$0xf]  ;;  %v771_v6 = vor.u32 %v1004_v59, %v768_v61 }
  0x1c   :  { %358 = vmatpush.bf16.msrb.mxu1 %v851_v47  ;;  %v1003_v3 = vld [vmem:[%s1561_s3 + $0x24] sm:$0xf0]  ;;  %v822_v4 = vld [vmem:[%s1561_s3 + $0xa0] sm:$0xf]  ;;  %v835_v7 = vor.u32 %v1020_v62, %v832_v63  ;;  %v1002_v8 = vld [vmem:[%s1561_s3 + $0x24] sm:$0xf] }
  0x1d   :  { %320 = vmatpush.bf16.msra.mxu2 %v775_v50  ;;  %v1019_v5 = vld [vmem:[%s1561_s3 + $0xa4] sm:$0xf0]  ;;  %v760_v9 = vld [vmem:[%s1561_s3 + $0x28] sm:$0xf0]  ;;  %v759_v10 = vor.u32 %v1003_v3, %v758_v2  ;;  %v1018_v12 = vld [vmem:[%s1561_s3 + $0xa4] sm:$0xf] }
  0x1e   :  { %333 = vmatpush.bf16.msra.mxu3 %v839_v51  ;;  %v823_v11 = vor.u32 %v1019_v5, %v822_v4  ;;  %v824_v13 = vld [vmem:[%s1561_s3 + $0xa8] sm:$0xf0]  ;;  %v763_v14 = vor.u32 %v1002_v8, %v760_v9  ;;  %v750_v16 = vld [vmem:[%s1561_s3 + $0x10] sm:$0xf]  ;;  %v1001_v17 = vld [vmem:[%s1561_s3 + $0x14] sm:$0xf0] }
  0x1f   :  { %346 = vmatpush.bf16.msrb.mxu0 %v779_v58  ;;  %v827_v15 = vor.u32 %v1018_v12, %v824_v13  ;;  %v814_v18 = vld [vmem:[%s1561_s3 + $0x90] sm:$0xf]  ;;  %v751_v19 = vor.u32 %v1001_v17, %v750_v16  ;;  %v1017_v20 = vld [vmem:[%s1561_s3 + $0x94] sm:$0xf0]  ;;  %v1000_v21 = vld [vmem:[%s1561_s3 + $0x14] sm:$0xf] }
  0x20   :  { %359 = vmatpush.bf16.msrb.mxu1 %v843_v60  ;;  %v752_v22 = vld [vmem:[%s1561_s3 + $0x18] sm:$0xf0]  ;;  %v815_v23 = vor.u32 %v1017_v20, %v814_v18  ;;  %v1016_v25 = vld [vmem:[%s1561_s3 + $0x94] sm:$0xf]  ;;  %v742_v28 = vld [vmem:[%s1561_s3] sm:$0xf] }
  0x21   :  { %321 = vmatpush.bf16.msra.mxu2 %v767_v0  ;;  %v755_v24 = vor.u32 %v1000_v21, %v752_v22  ;;  %v816_v26 = vld [vmem:[%s1561_s3 + $0x98] sm:$0xf0]  ;;  %v999_v29 = vld [vmem:[%s1561_s3 + $0x4] sm:$0xf0]  ;;  %v806_v30 = vld [vmem:[%s1561_s3 + $0x80] sm:$0xf] }
  0x22   :  { %334 = vmatpush.bf16.msra.mxu3 %v831_v1  ;;  %v819_v27 = vor.u32 %v1016_v25, %v816_v26  ;;  %v743_v31 = vor.u32 %v999_v29, %v742_v28  ;;  %v1015_v32 = vld [vmem:[%s1561_s3 + $0x84] sm:$0xf0]  ;;  %v998_v33 = vld [vmem:[%s1561_s3 + $0x4] sm:$0xf]  ;;  %v744_v34 = vld [vmem:[%s1561_s3 + $0x8] sm:$0xf0] }
  0x23   :  { %347 = vmatpush.bf16.msrb.mxu0 %v771_v6  ;;  %v807_v35 = vor.u32 %v1015_v32, %v806_v30  ;;  %v747_v36 = vor.u32 %v998_v33, %v744_v34  ;;  %v1014_v37 = vld [vmem:[%s1561_s3 + $0x84] sm:$0xf]  ;;  %v808_v38 = vld [vmem:[%s1561_s3 + $0x88] sm:$0xf0]  ;;  %v1045_v40 = vld [vmem:[%s1563_s5 + $0x78] sm:$0xff]  ;;  %s703_s19 = sshll.u32 %s1567_s9, 4  ;;  %s704_s19 = int_to_ptr.hbm [resolvable:$true] %s703_s19 }
  0x24   :  { %360 = vmatpush.bf16.msrb.mxu1 %v835_v7  ;;  %v811_v39 = vor.u32 %v1014_v37, %v808_v38  ;;  %v1061_v41 = vld [vmem:[%s1565_s7 + $0x78] sm:$0xff]  ;;  %v1044_v44 = vld [vmem:[%s1563_s5 + $0x70] sm:$0xff]  ;;  %v1043_v48 = vld [vmem:[%s1563_s5 + $0x68] sm:$0xff]  ;;  %vm693_vm1 = vcmask 64512   ;;  %s714_s22 = sshll.u32 %s1568_s10, 4  ;;  %s715_s22 = int_to_ptr.hbm [resolvable:$true] %s714_s22 }
  0x25   :  { %322 = vmatpush.bf16.msra.mxu2 %v759_v10  ;;  %v1037_v42 = vld [vmem:[%s1563_s5 + $0x38] sm:$0xff]  ;;  %v1060_v45 = vld [vmem:[%s1565_s7 + $0x70] sm:$0xff]  ;;  %v1059_v49 = vld [vmem:[%s1565_s7 + $0x68] sm:$0xff] }
  0x26   :  { %335 = vmatpush.bf16.msra.mxu3 %v823_v11  ;;  %v1053_v43 = vld [vmem:[%s1565_s7 + $0x38] sm:$0xff]  ;;  %v1036_v46 = vld [vmem:[%s1563_s5 + $0x30] sm:$0xff]  ;;  %v1035_v50 = vld [vmem:[%s1563_s5 + $0x28] sm:$0xff] }
  0x27   :  { %348 = vmatpush.bf16.msrb.mxu0 %v763_v14  ;;  %v1052_v47 = vld [vmem:[%s1565_s7 + $0x30] sm:$0xff]  ;;  %v1051_v51 = vld [vmem:[%s1565_s7 + $0x28] sm:$0xff]  ;;  %v1042_v52 = vld [vmem:[%s1563_s5 + $0x60] sm:$0xff] }
  0x28   :  { %361 = vmatpush.bf16.msrb.mxu1 %v827_v15  ;;  %v1058_v53 = vld [vmem:[%s1565_s7 + $0x60] sm:$0xff]  ;;  %v1041_v56 = vld [vmem:[%s1563_s5 + $0x58] sm:$0xff]  ;;  %v1040_v59 = vld [vmem:[%s1563_s5 + $0x50] sm:$0xff] }
  0x29   :  { %323 = vmatpush.bf16.msra.mxu2 %v751_v19  ;;  %v1034_v54 = vld [vmem:[%s1563_s5 + $0x20] sm:$0xff]  ;;  %v1057_v57 = vld [vmem:[%s1565_s7 + $0x58] sm:$0xff]  ;;  %v1056_v60 = vld [vmem:[%s1565_s7 + $0x50] sm:$0xff] }
  0x2a   :  { %336 = vmatpush.bf16.msra.mxu3 %v815_v23  ;;  %v1050_v55 = vld [vmem:[%s1565_s7 + $0x20] sm:$0xff]  ;;  %v1033_v9 = vld [vmem:[%s1563_s5 + $0x18] sm:$0xff]  ;;  %v1039_v11 = vld [vmem:[%s1563_s5 + $0x48] sm:$0xff] }
  0x2b   :  { %349 = vmatpush.bf16.msrb.mxu0 %v755_v24  ;;  %v69_v58 = vld [vmem:[%s1560_s2] sm:$0x3]  ;;  %v1049_v10 = vld [vmem:[%s1565_s7 + $0x18] sm:$0xff]  ;;  %v1055_v12 = vld [vmem:[%s1565_s7 + $0x48] sm:$0xff] }
  0x2c   :  { %362 = vmatpush.bf16.msrb.mxu1 %v819_v27  ;;  %v71_v61 = vperm.slane %v69_v58, 0  ;;  %v72_v62 = vperm.slane %v69_v58, 1  ;;  %v1032_v13 = vld [vmem:[%s1563_s5 + $0x10] sm:$0xff]  ;;  %v1038_v15 = vld [vmem:[%s1563_s5 + $0x40] sm:$0xff]  ;;  %v1031_v17 = vld [vmem:[%s1563_s5 + $0x8] sm:$0xff] }
  0x2d   :  { %324 = vmatpush.bf16.msra.mxu2 %v743_v31  ;;  %v1048_v14 = vld [vmem:[%s1565_s7 + $0x10] sm:$0xff]  ;;  %v1054_v16 = vld [vmem:[%s1565_s7 + $0x40] sm:$0xff]  ;;  %v1047_v18 = vld [vmem:[%s1565_s7 + $0x8] sm:$0xff] }
  0x2e   :  { %337 = vmatpush.bf16.msra.mxu3 %v807_v35  ;;  %v1030_v19 = vld [vmem:[%s1563_s5] sm:$0xff]  ;;  %v151_v21 = vld [vmem:[#allocation5] sm:$0x3] }
  0x2f   :  { %350 = vmatpush.bf16.msrb.mxu0 %v747_v36  ;;  %v1046_v20 = vld [vmem:[%s1565_s7] sm:$0xff]  ;;  %v154_v22 = vperm.slane %v151_v21, 1  ;;  %v153_v27 = vperm.slane %v151_v21, 0 }
  0x30   :  { %363 = vmatpush.bf16.msrb.mxu1 %v811_v39 }
  0x31   :  { %505 = vmatpush.bf16.msrb.mxu2 %v1037_v42 }
  0x32   :  { %518 = vmatpush.bf16.msrb.mxu3 %v1045_v40 }
  0x33   :  { %663 = vmatpush.bf16.msra.mxu0 %v1053_v43 }
  0x34   :  { %676 = vmatpush.bf16.msra.mxu1 %v1061_v41  ;;  %v1066_v41 = vld [vmem:[%s1566_s8] ss:$0 sm:$0xff] }
  0x35   :  { %506 = vmatpush.bf16.msrb.mxu2 %v1036_v46 }
  0x36   :  { %519 = vmatpush.bf16.msrb.mxu3 %v1044_v44 }
  0x37   :  { %664 = vmatpush.bf16.msra.mxu0 %v1052_v47  ;;  %v1067_v47 = vld [vmem:[%s1564_s6] ss:$0 sm:$0xff]  ;;  %s1177_s6 = smov [#allocation8]  }
  0x38   :  { %677 = vmatpush.bf16.msra.mxu1 %v1060_v45  ;;  %s712_s8 = sshll.u32 %s1177_s6, 4  ;;  %s713_s8 = int_to_ptr.vmem [resolvable:$true] %s712_s8 }
  0x39   :  { %507 = vmatpush.bf16.msrb.mxu2 %v1035_v50 }
  0x3a   :  { %520 = vmatpush.bf16.msrb.mxu3 %v1043_v48 }
  0x3b   :  { %665 = vmatpush.bf16.msra.mxu0 %v1051_v51 }
  0x3c   :  { %678 = vmatpush.bf16.msra.mxu1 %v1059_v49 }
  0x3d   :  { %508 = vmatpush.bf16.msrb.mxu2 %v1034_v54 }
  0x3e   :  { %521 = vmatpush.bf16.msrb.mxu3 %v1042_v52 }
  0x3f   :  { %666 = vmatpush.bf16.msra.mxu0 %v1050_v55 }
  0x40   :  { %679 = vmatpush.bf16.msra.mxu1 %v1058_v53 }
  0x41   :  { %509 = vmatpush.bf16.msrb.mxu2 %v1033_v9 }
  0x42   :  { %522 = vmatpush.bf16.msrb.mxu3 %v1041_v56 }
  0x43   :  { %667 = vmatpush.bf16.msra.mxu0 %v1049_v10 }
  0x44   :  { %680 = vmatpush.bf16.msra.mxu1 %v1057_v57 }
  0x45   :  { %510 = vmatpush.bf16.msrb.mxu2 %v1032_v13 }
  0x46   :  { %523 = vmatpush.bf16.msrb.mxu3 %v1040_v59 }
  0x47   :  { %668 = vmatpush.bf16.msra.mxu0 %v1048_v14 }
  0x48   :  { %681 = vmatpush.bf16.msra.mxu1 %v1056_v60 }
  0x49   :  { %511 = vmatpush.bf16.msrb.mxu2 %v1031_v17 }
  0x4a   :  { %524 = vmatpush.bf16.msrb.mxu3 %v1039_v11 }
  0x4b   :  { %669 = vmatpush.bf16.msra.mxu0 %v1047_v18 }
  0x4c   :  { %682 = vmatpush.bf16.msra.mxu1 %v1055_v12 }
  0x4d   :  { %512 = vmatpush.bf16.msrb.mxu2 %v1030_v19 }
  0x4e   :  { %525 = vmatpush.bf16.msrb.mxu3 %v1038_v15 }
  0x4f   :  { %670 = vmatpush.bf16.msra.mxu0 %v1046_v20 }
  0x50   :  { %683 = vmatpush.bf16.msra.mxu1 %v1054_v16 }
  0x8f   :  { %v98_v63 = vpop.f32.mrf.mxu0 }
  0x90   :  { %v99_v0 = vadd.f32 %v98_v63, %v71_v61  ;;  %v111_v1 = vpop.f32.mrf.mxu1 }
  0x91   :  { %v112_v2 = vadd.f32 %v111_v1, %v72_v62 }
  0x92   :  { %v115_v3 = vmax.f32 %v99_v0, 0.0 }
  0x93   :  { %v116_v4 = vmax.f32 %v112_v2, 0.0 }
  0x94   :  { %v117_v5 = vpack.c.bf16 %v115_v3, %v115_v3 }
  0x95   :  { %v118_v6 = vpack.c.bf16 %v116_v4, %v116_v4 }
  0x96   :  { %325 = vmatmul.bf16.vlgmr.msra.gmra.mxu2 %v117_v5  ;;  %351 = vmatmul.bf16.vlgmr.msrb.gmra.mxu0 %v117_v5 }
  0x97   :  { %338 = vmatmul.bf16.vlgmr.msra.gmra.mxu3 %v118_v6  ;;  %364 = vmatmul.bf16.vlgmr.msrb.gmra.mxu1 %v118_v6  ;;  %v100_v7 = vpop.f32.mrf.mxu0 }
  0x98   :  { %v113_v8 = vpop.f32.mrf.mxu1 }
 0x113   :  { %v352_v23 = vpop.f32.mrf.mxu0 }
 0x114   :  { %v353_v24 = vadd.f32 %v352_v23, %v154_v22  ;;  %v365_v25 = vpop.f32.mrf.mxu1 }
 0x116   :  { %v366_v26 = vadd.f32 %v365_v25, %v353_v24 }
 0x118   :  { %v370_v28 = vmax.f32 %v366_v26, 0.0 }
 0x119   :  { %v326_v29 = vpop.f32.mrf.mxu2 }
 0x11a   :  { %v372_v30 = vpack.c.bf16 %v370_v28, %v370_v28  ;;  %v327_v31 = vadd.f32 %v326_v29, %v153_v27  ;;  %v339_v32 = vpop.f32.mrf.mxu3 }
 0x11b   :  { %v354_v33 = vpop.f32.mrf.mxu0 }
 0x11c   :  { %v340_v34 = vadd.f32 %v339_v32, %v327_v31  ;;  %v367_v35 = vpop.f32.mrf.mxu1  ;;  %526 = vmatmul.bf16.vlgmr.msrb.gmra.mxu3 %v372_v30  ;;  %684 = vmatmul.bf16.vlgmr.msra.gmra.mxu1 %v372_v30 }
 0x11e   :  { %v369_v36 = vmax.f32 %v340_v34, 0.0 }
 0x120   :  { %v371_v37 = vpack.c.bf16 %v369_v36, %v369_v36 }
 0x121   :  { %v328_v38 = vpop.f32.mrf.mxu2 }
 0x122   :  { %v341_v39 = vpop.f32.mrf.mxu3  ;;  %513 = vmatmul.bf16.vlgmr.msrb.gmra.mxu2 %v371_v37  ;;  %671 = vmatmul.bf16.vlgmr.msra.gmra.mxu0 %v371_v37 }
 0x199   :  { %v685_v40 = vpop.f32.mrf.mxu1 }
 0x19f   :  { %v527_v42 = vpop.f32.mrf.mxu3  ;;  %v672_v43 = vpop.f32.mrf.mxu0 }
 0x1a0   :  { %v673_v44 = vadd.f32 %v1066_v41, %v672_v43 }
 0x1a1   :  { %v687_v45 = vpop.f32.mrf.mxu1 }
 0x1a2   :  { %v686_v46 = vadd.f32 %v685_v40, %v673_v44 }
 0x1a4   :  { %1068 = vtanh.f32 %v686_v46 }
 0x1a5   :  { %v514_v48 = vpop.f32.mrf.mxu2 }
 0x1a6   :  { %v515_v49 = vadd.f32 %v1067_v47, %v514_v48 }
 0x1a7   :  { %v529_v50 = vpop.f32.mrf.mxu3  ;;  %v674_v51 = vpop.f32.mrf.mxu0 }
 0x1a8   :  { %v528_v52 = vadd.f32 %v527_v42, %v515_v49 }
 0x1aa   :  { %v1069_v53 = vpop.eup %1068  ;;  %694 = vst.msk [vmem:[#allocation7] sm:$0xff] %vm693_vm1, %v528_v52 }
 0x1ab   :  { %v690_v54 = vadd.f32 1.0, %v1069_v53  ;;  %706 = dma.vmem_to_hbm [thread:$0]  %s702_s1, 128, %s704_s19, [#allocation4]  }
 0x1ad   :  { %v691_v55 = vmul.f32 11.0, %v690_v54  ;;  %v516_v56 = vpop.f32.mrf.mxu2 }
 0x1af   :  { %v692_v57 = vadd.f32 -20.0, %v691_v55 }
 0x1b1   :  { %695 = vst.msk [vmem:[#allocation8] sm:$0xff] %vm693_vm1, %v692_v57 }
 0x1b2   :  { %717 = dma.vmem_to_hbm [thread:$0]  %s713_s8, 128, %s715_s22, [#allocation9]  }
 0x1b3   :  { %1170 = dma.done.wait [#allocation4], 128  }
 0x1b4   :  { %1171 = vsyncadd [#allocation4], 4294967168 }
 0x1b5   :  { %1172 = dma.done.wait [#allocation9], 128  }
 0x1b6   :  { %1173 = vsyncadd [#allocation9], 4294967168 }
 0x1b7   :  { %726 = vsyncpa [#allocation3], 1 }
 0x1b8   :  { %727 = vsyncpa [#allocation6], 1 }
 0x1b9   :  { %728 = vsyncpa [#allocation4], 1 }
 0x1ba   :  { %729 = vsyncpa [#allocation9], 1 }

</bundles_post_ra>
